<compile_context>
chip_gen: v6e
topology: v6e:2x2x1
jax: 0.10.0
libtpu: 0.0.40
codegen_flags: <defaults>
</compile_context>

<pallas_src>
import jax
import jax.numpy as jnp
from jax.experimental import pallas as pl
from jax.experimental.pallas import tpu as pltpu


def _cdiv(a, b):
    return -(-a // b)


def _conv1x1_bn_relu_kernel(x_ref, w_ref, shift_ref, o_ref):
    # x_ref: (1, C, thw), w_ref: (K, C) [BN scale pre-folded], shift_ref: (K, 1),
    # o_ref: (1, K, thw)
    y = jnp.dot(w_ref[...], x_ref[0],
                preferred_element_type=jnp.float32)          # (K, thw)
    y = y + shift_ref[...]                                   # broadcast (K, 1)
    o_ref[0] = jnp.maximum(y, 0.0).astype(o_ref.dtype)


def conv1x1_bn_relu(x_nchw, conv_w, conv_b, bn_gamma, bn_beta, bn_mean, bn_var,
                    eps=1e-5,
                    vmem_block_budget_bytes=40 << 20,   # double-buffered x+out blocks
                    max_thw=128 * 1024):
    """x_nchw: (N, C, H, W); conv_w: (K, C, 1, 1); conv_b: (K,)."""
    N, C, H, W = x_nchw.shape
    K = conv_w.shape[0]
    HW = H * W
    dtype_bytes = jnp.dtype(x_nchw.dtype).itemsize

    # Fold BN (eval mode) + conv bias: scale goes into the weight, shift stays.
    scale = bn_gamma / jnp.sqrt(bn_var + eps)                 # (K,)
    shift = (bn_beta + (conv_b - bn_mean) * scale).reshape(K, 1)
    w_kc = conv_w.reshape(K, C) * scale[:, None]              # (K, C), scale folded

    x3 = x_nchw.reshape(N, C, HW)                             # free reshape (NCHW)

    # --- Spatial (lane) tile selection ---------------------------------------
    # Last block dim must be a multiple of 128 or equal the full extent.
    if HW <= 128:
        thw_eff = HW                                          # full extent, allowed
    else:
        hw_rounded = _cdiv(HW, 128) * 128
        # Largest tile that keeps double-buffered (x + out) blocks in budget.
        cap_vmem = (vmem_block_budget_bytes // (2 * (C + K) * dtype_bytes)) // 128 * 128
        thw_eff = max(128, min(cap_vmem, max_thw, hw_rounded))
        # Keep both v7x TensorCores busy when the batch axis alone can't.
        if N == 1 and hw_rounded >= 256:
            half = _cdiv(_cdiv(HW, 2), 128) * 128
            thw_eff = max(128, min(thw_eff, half))

    n_hw_tiles = _cdiv(HW, thw_eff)
    grid = (N, n_hw_tiles)

    cost = pl.CostEstimate(
        flops=2 * N * HW * K * C,
        transcendentals=0,
        bytes_accessed=int((N * HW * (C + K) + K * C + K) * dtype_bytes))

    out3 = pl.pallas_call(
        _conv1x1_bn_relu_kernel,
        out_shape=jax.ShapeDtypeStruct((N, K, HW), x_nchw.dtype),
        grid_spec=pltpu.PrefetchScalarGridSpec(
            num_scalar_prefetch=0,
            grid=grid,
            in_specs=[
                pl.BlockSpec((1, C, thw_eff), lambda n, t: (n, 0, t)),
                pl.BlockSpec((K, C), lambda n, t: (0, 0)),
                pl.BlockSpec((K, 1), lambda n, t: (0, 0)),
            ],
            out_specs=pl.BlockSpec((1, K, thw_eff), lambda n, t: (n, 0, t)),
        ),
        compiler_params=pltpu.CompilerParams(
            dimension_semantics=("parallel", "parallel"),
            vmem_limit_bytes=48 << 20),
        cost_estimate=cost,
    )(x3, w_kc, shift)

    return out3.reshape(N, K, H, W)


if __name__ == "__main__":
    key = jax.random.PRNGKey(0)
    k_x, k_w, k_b, k_g, k_be, k_m, k_v = jax.random.split(key, 7)

    # ck(i=4, k=8, use_normalization=True); small shapes.
    N, C_in, C_out, H, W = 2, 4, 8, 16, 16

    x = jax.random.normal(k_x, (N, C_in, H, W), dtype=jnp.float32)
    conv_w = jax.random.normal(k_w, (C_out, C_in, 1, 1), dtype=jnp.float32) * 0.1
    conv_b = jax.random.normal(k_b, (C_out,), dtype=jnp.float32) * 0.1
    bn_gamma = 1.0 + 0.1 * jax.random.normal(k_g, (C_out,), dtype=jnp.float32)
    bn_beta = 0.1 * jax.random.normal(k_be, (C_out,), dtype=jnp.float32)
    bn_mean = 0.05 * jax.random.normal(k_m, (C_out,), dtype=jnp.float32)
    bn_var = jnp.abs(1.0 + 0.1 * jax.random.normal(k_v, (C_out,), dtype=jnp.float32))

    out = conv1x1_bn_relu(x, conv_w, conv_b, bn_gamma, bn_beta, bn_mean, bn_var)
    out = jax.block_until_ready(out)

    # Pure-JAX reference for sanity.
    eps = 1e-5
    y_ref = jnp.einsum("nchw,kc->nkhw", x, conv_w.reshape(C_out, C_in)) \
        + conv_b[None, :, None, None]
    s = bn_gamma / jnp.sqrt(bn_var + eps)
    y_ref = (y_ref - bn_mean[None, :, None, None]) * s[None, :, None, None] \
        + bn_beta[None, :, None, None]
    y_ref = jnp.maximum(y_ref, 0.0)
    assert out.shape == (N, C_out, H, W)
    assert jnp.allclose(out, y_ref, atol=1e-5, rtol=1e-5)

    print("KERNEL_OK")
</pallas_src>

<mosaic_0001>
module attributes {stable_mosaic.version = 11 : i64} {
  func.func @_conv1x1_bn_relu_kernel(%arg0: i32, %arg1: i32, %arg2: memref<1x4x256xf32, #tpu.memory_space<vmem>>, %arg3: memref<8x4xf32, #tpu.memory_space<vmem>>, %arg4: memref<8x1xf32, #tpu.memory_space<vmem>>, %arg5: memref<1x8x256xf32, #tpu.memory_space<vmem>>) attributes {dimension_semantics = [#tpu.dimension_semantics<parallel>, #tpu.dimension_semantics<parallel>], iteration_bounds = array<i64: 2, 1>, scalar_prefetch = 0 : i64, scratch_operands = 0 : i64, tpu.core_type = #tpu.core_type<tc>, window_params = [{transform_indices = @transform_0, window_bounds = array<i64: 1, 4, 256>}, {pipeline_mode = #tpu.pipeline_mode<synchronous>, transform_indices = @transform_1, window_bounds = array<i64: 8, 4>}, {pipeline_mode = #tpu.pipeline_mode<synchronous>, transform_indices = @transform_2, window_bounds = array<i64: 8, 1>}, {transform_indices = @transform_3, window_bounds = array<i64: 1, 8, 256>}]} {
    %c0 = arith.constant 0 : index
    %c0_0 = arith.constant 0 : index
    %0 = vector.load %arg3[%c0, %c0_0] : memref<8x4xf32, #tpu.memory_space<vmem>>, vector<8x4xf32>
    %c0_1 = arith.constant 0 : index
    %c0_2 = arith.constant 0 : index
    %c0_3 = arith.constant 0 : index
    %1 = vector.load %arg2[%c0_1, %c0_2, %c0_3] : memref<1x4x256xf32, #tpu.memory_space<vmem>>, vector<1x4x256xf32>
    %2 = vector.shape_cast %1 : vector<1x4x256xf32> to vector<4x256xf32>
    %cst = arith.constant dense<0.000000e+00> : vector<8x256xf32>
    %3 = tpu.matmul %0, %2, %cst {dimension_numbers = #tpu.dot_dimension_numbers<[1], [0], [0], [1], [0, 0, 1, 1], [], []>} : vector<8x4xf32>, vector<4x256xf32>, vector<8x256xf32> -> vector<8x256xf32>
    %c0_4 = arith.constant 0 : index
    %c0_5 = arith.constant 0 : index
    %4 = vector.load %arg4[%c0_4, %c0_5] : memref<8x1xf32, #tpu.memory_space<vmem>>, vector<8x1xf32>
    %5 = vector.broadcast %4 : vector<8x1xf32> to vector<8x256xf32>
    %6 = arith.addf %3, %5 : vector<8x256xf32>
    %cst_6 = arith.constant 0.000000e+00 : f32
    %7 = vector.broadcast %cst_6 : f32 to vector<8x256xf32>
    %8 = arith.maximumf %6, %7 : vector<8x256xf32>
    %c0_7 = arith.constant 0 : index
    %c0_8 = arith.constant 0 : index
    %c0_9 = arith.constant 0 : index
    %9 = vector.load %arg5[%c0_7, %c0_8, %c0_9] : memref<1x8x256xf32, #tpu.memory_space<vmem>>, vector<1x8x256xf32>
    %10 = vector.shape_cast %9 : vector<1x8x256xf32> to vector<8x256xf32>
    %11 = vector.shape_cast %8 : vector<8x256xf32> to vector<1x8x256xf32>
    tpu.vector_store %arg5[%c0_7, %c0_8, %c0_9], %11 {strides = array<i32>} : memref<1x8x256xf32, #tpu.memory_space<vmem>>, vector<1x8x256xf32>,
    return
  }
  func.func @transform_0(%arg0: i32, %arg1: i32) -> (i32, i32, i32) {
    %c0_i32 = arith.constant 0 : i32
    %c0_i32_0 = arith.constant 0 : i32
    return %arg0, %c0_i32, %arg1 : i32, i32, i32
  }
  func.func @transform_1(%arg0: i32, %arg1: i32) -> (i32, i32) {
    %c0_i32 = arith.constant 0 : i32
    %c0_i32_0 = arith.constant 0 : i32
    %c0_i32_1 = arith.constant 0 : i32
    return %c0_i32, %c0_i32_0 : i32, i32
  }
  func.func @transform_2(%arg0: i32, %arg1: i32) -> (i32, i32) {
    %c0_i32 = arith.constant 0 : i32
    %c0_i32_0 = arith.constant 0 : i32
    %c0_i32_1 = arith.constant 0 : i32
    return %c0_i32, %c0_i32_0 : i32, i32
  }
  func.func @transform_3(%arg0: i32, %arg1: i32) -> (i32, i32, i32) {
    %c0_i32 = arith.constant 0 : i32
    %c0_i32_0 = arith.constant 0 : i32
    return %arg0, %c0_i32, %arg1 : i32, i32, i32
  }
}

</mosaic_0001>

<bundles_post_ra>
// kernel: tpu_custom_call.1
= control target key start
LH: loop header
LB: loop body
LE: loop exit
PB: predicated region body
PF: predicated region fallthrough
CT: control target
= control target key end

     0   :  { %8 = vsyncpa [#allocation3], 0  ;;  %s670_s0 = inlined_call_operand.vmem [shape: f32[2,4,256], index: 0, kind: input, shape index: {}]   ;;  %s671_s1 = inlined_call_operand.vmem [shape: f32[8,4], index: 1, kind: input, shape index: {}]   ;;  %s672_s2 = inlined_call_operand.vmem [shape: f32[8,1], index: 2, kind: input, shape index: {}]   ;;  %s673_s3 = inlined_call_operand.hbm [shape: f32[2,8,256], index: 3, kind: output, shape index: {}]  }
   0x1   :  { %10 = vsyncpa [#allocation3 + $0x1], 0  ;;  %s565_s12 = smov 0   ;;  %s567_s13 = smov 0  }
   0x2   :  { %s569_s14 = smov 0   ;;  %s571_s15 = smov 0  }
   0x3   :  { %s573_s16 = smov 0   ;;  %s575_s17 = smov 0  }
   0x4 LB: > { %s387_s18 = sadd.s32 4294967295, %s540_s17   ;;  %s388_s19 = sadd.s32 4294967294, %s540_s17   ;;  %s540_s17 = sphi %s575_s17, %s16_s17   ;;  %s536_s16 = sphi %s573_s16, %s680_s16   ;;  %s532_s15 = sphi %s571_s15, %s679_s15   ;;  %s528_s14 = sphi %s569_s14, %s678_s14   ;;  %s524_s13 = sphi %s567_s13, %s677_s13   ;;  %s520_s12 = sphi %s565_s12, %s676_s12  }
   0x5   : > { %s28_s20 = sadd.s32 1, %s536_s16  ;;  %s107_s21 = sadd.s32 1, %s528_s14 }
   0x6   : > { %p30_p0 = scmp.ge.s32.totalorder %s28_s20, 2  ;;  %p117_p1 = scmp.ne.s32.totalorder %s528_s14, %s524_s13 }
   0x7   : > { %p118_p2 = scmp.eq.s32.totalorder %s387_s18, 1  ;;  %p123_p3 = scmp.ne.s32.totalorder %s524_s13, %s520_s12 }
   0x8   : > { %s682_s20 = smov (%p30_p0, %s28_s20), 0  ;;  %p124_p5 = scmp.eq.s32.totalorder %s388_s19, 1 }
   0x9   : > { %p605_p4 = por %p118_p2, %p117_p1  ;;  %s102_s23 = ssub.s32 %s536_s16, %s682_s20 }
   0xa   : > { %p391_p6 = scmp.ge.s32.totalorder %s540_s17, 1  ;;  %p105_p7 = scmp.eq.s32.totalorder %s102_s23, 0 }
   0xb   : > { %p612_p8 = por %p124_p5, %p123_p3  ;;  %p161_p9 = scmp.lt.s32.totalorder %s540_s17, 3 }
   0xc   : > { %s618_s25 = scalar_select %p105_p7, %s528_s14, %s107_s21  }
   0xd   : > { %p162_p10 = pnand %p391_p6, %p161_p9 }
   0xe   : > { %p190_p11 = scmp.lt.s32.totalorder (!%p162_p10), %s532_s15, 1  ;;  %s186_s8 = sand.u32 (!%p162_p10), 1, %s524_s13  }
   0xf   : > { %165 = sbr.rel (%p162_p10) target bundleno = 241 (0xf1), region = 32  ;;  %s392_s9 = sshll.u32 (!%p162_p10), %s186_s8, 4 }
  0x10   : > { %s404_s10 = sshll.u32 (!%p162_p10), %s532_s15, 8  ;;  %s188_s11 = scalar_lea.vmem (!%p162_p10), [#allocation2], %s392_s9 }
  0x11   : > { %s311_s18 = sshll.u32 (!%p162_p10), %s188_s11, 4  ;;  %s309_s23 = scalar_lea.hbm (!%p162_p10), %s673_s3, %s404_s10  ;;  %s312_s18 = int_to_ptr.vmem [resolvable:$true] %s311_s18 }
  0x12   : > { %s295_s26 = scalar_lea.sflag (!%p162_p10), [#allocation3], %s186_s8  ;;  %s464_s27 = scalar_lea.vmem (!%p162_p10), %s312_s18, 256 }
  0x13   : > { %p465_p12 = scmp.ne.s32.totalorder (!%p162_p10), %s312_s18, %s464_s27 }
  0x14   : > { %v542_v0 = vmov 0.0   ;;  %v543_v1 = vmov 0   ;;  %v202_v2 = vld [vmem:[%s672_s2] sm:$0xff]  ;;  %s191_s28 = scalar_select %p190_p11, %s532_s15, 1  ;;  %vm214_vm0 = vcmask 1043456   ;;  %vm210_vm1 = vcmask 31744  }
  0x15   : > { %283 = vmatprep.mubr.f32.mxu0 %v542_v0  ;;  %462 = vset.pattern.permute.xlu0 %v543_v1  ;;  %v200_v5 = vld [vmem:[%s671_s1] sm:$0xff]  ;;  %p466_p13 = pnand %p465_p12, %p605_p4 }
  0x16   : > { %205 = vperm.xlu0 %462, %v202_v2   ;;  %s403_s29 = sshll.u32 %s191_s28, 3  ;;  %s544_s28 = smov [#allocation2]  }
  0x17   : > { %s197_s5 = scalar_lea.vmem %s670_s0, %s403_s29  ;;  %p467_p0 = pneg %p466_p13 }
  0x18   : > { %v201_v3 = vld [vmem:[%s197_s5] sm:$0xff]  ;;  %s468_s15 = sshll.u32 %s544_s28, 4  ;;  %s469_s15 = int_to_ptr.vmem [resolvable:$false] %s468_s15 }
  0x19   : > { %v209_v4 = vcombine.high %v201_v3, %v201_v3  ;;  %s470_s29 = scalar_lea.vmem %s469_s15, 512  ;;  %p471_p1 = scmp.lt.s32.totalorder %s312_s18, %s469_s15 }
  0x1a   : > { %p472_p2 = scmp.lt.s32.totalorder %s470_s29, %s464_s27 }
  0x1b   : > { %395 = vmatprep.subr.msk.mxu0 %vm214_vm0, %v209_v4 }
  0x1c   : > { %396 = vmatpush1.msk.msra.mxu0 %vm214_vm0, %v201_v3  ;;  %p473_p3 = por %p472_p2, %p471_p1 }
  0x1d   : > { %397 = vmatmul.mubr.msk.f32.vlgmr.msra.gmra.mxu0 %vm210_vm1, %v200_v5 }
  0x1e   : > { %p474_p5 = pnand %p473_p3, %p467_p0 }
  0x91   : > { %v206_v6 = vpop.permute.xlu0 %205 }
  0xdd   : > { %v285_v7 = vpop.f32.mrf.mxu0 }
  0xde   : > { %v286_v8 = vadd.f32 %v285_v7, %v206_v6 }
  0xdf   : > { %v287_v9 = vpop.f32.mrf.mxu0 }
  0xe0   : > { %v290_v10 = vmax.f32 %v286_v8, 0.0  ;;  %v288_v11 = vadd.f32 %v287_v9, %v206_v6 }
  0xe2   : > { %292 = vst [vmem:[%s188_s11] sm:$0xff] %v290_v10  ;;  %v291_v12 = vmax.f32 %v288_v11, 0.0 }
  0xe4   : > { %293 = vst [vmem:[%s188_s11 + $0x8] sm:$0xff] %v291_v12 }
  0xe5   : > { %477 = shalt.err (!%p474_p5)
}
  0xe6   : > { %s478_s30 = scalar_lea.hbm %s309_s23, 256  ;;  %s482_s6 = scalar_lea.hbm %s673_s3, 512 }
  0xe7   : > { %p479_p6 = scmp.ne.s32.totalorder %s309_s23, %s478_s30  ;;  %p483_p10 = scmp.lt.s32.totalorder %s309_s23, %s673_s3 }
  0xe8   : > { %p484_p11 = scmp.lt.s32.totalorder %s482_s6, %s478_s30 }
  0xe9   : > { %p480_p7 = pnand %p479_p6, %p605_p4 }
  0xea   : > { %p485_p12 = por %p484_p11, %p483_p10 }
  0xeb   : > { %p481_p9 = pneg %p480_p7 }
  0xed   : > { %p486_p13 = pnand %p485_p12, %p481_p9 }
  0xef   : > { %489 = shalt.err (!%p486_p13)
}
  0xf0   : > { %405 = dma.vmem_to_hbm [thread:$0]  (%p605_p4), %s312_s18, 256, %s309_s23, %s295_s26  }
  0xf1 PF: > { %p411_p0 = scmp.ge.s32.totalorder %s540_s17, 2  ;;  %s323_s9 = sand.u32 1, %s520_s12  }
  0xf2   : > { %s324_s10 = scalar_lea.sflag [#allocation3], %s323_s9 }
  0xf3   : > { %p408_p1 = pnand %p411_p0, %p612_p8 }
  0xf5   : > { %p409_p2 = pneg %p408_p1 }
  0xf7   : > { %515 = dma.done.wait (%p409_p2), %s324_s10, 256  }
  0xf8   : > { %517 = vsyncadd (%p409_p2), %s324_s10, 4294967040  ;;  %s16_s17 = sadd.s32 1, %s540_s17   ;;  %s676_s12 = smov %s524_s13 }
  0xf9   : > { %p13_p3 = scmp.ge.s32.totalorder %s16_s17, 4   ;;  %s677_s13 = smov %s528_s14 }
  0xfa   : > { %s678_s14 = smov %s618_s25  ;;  %s679_s15 = smov %s536_s16 }
  0xfb   : > { %s680_s16 = smov %s682_s20  ;;  %15 = sbr.rel (!%p13_p3) target bundleno = 4 (0x4), region = 67 }
 0x100   :  { %329 = vsyncpa [#allocation3], 1 }
 0x101   :  { %331 = vsyncpa [#allocation3 + $0x1], 1 }

</bundles_post_ra>
